<compile_context>
chip_gen: v7x
topology: tpu7x:2x2x1
jax: 0.10.0
libtpu: 0.0.40
codegen_flags: <defaults>
</compile_context>

<pallas_src>
import functools

import jax
import jax.numpy as jnp
from jax.experimental import pallas as pl
from jax.experimental.pallas import tpu as pltpu

KSIZE = 3
PAD = 1
LANES = 128
SUBLANES = 8


def _round_up(x, m):
    return (x + m - 1) // m * m


def _vmem_capacity_bytes():
    try:
        return int(pltpu.get_tpu_info().vmem_capacity_bytes)
    except Exception:
        return 64 * 1024 * 1024            # conservative (v7x-sized) fallback


def _pick_tb(nc, hw, itemsize, vmem_budget):
    """Planes per grid step (sublane tile): multiple of 8, or == nc if nc <= 8."""
    if nc <= SUBLANES:
        return nc                                            # full (small) dim
    hw_pad = _round_up(hw, LANES)                            # lane padding
    # double-buffered in + out DMA blocks, plus ~6 f32 planes of in-kernel
    # working set (f32 copy, accumulator, shifted temp, masks, slack).
    per_plane = (2 * 2 * itemsize + 6 * 4) * hw_pad
    tb = max(SUBLANES, (vmem_budget // per_plane) // SUBLANES * SUBLANES)
    tb = min(tb, nc // SUBLANES * SUBLANES)
    if nc >= 2 * SUBLANES:
        # keep >= 2 blocks so both v7x TensorCores get a share (megacore);
        # costs only ~0.35 us extra on single-TC v5e/v6e.
        tb = min(tb, _round_up(pl.cdiv(nc, 2), SUBLANES))
    # prefer an even number of grid blocks (v7x megacore balance)
    if pl.cdiv(nc, tb) > 1 and pl.cdiv(nc, tb) % 2 == 1:
        t = tb - SUBLANES
        while t >= SUBLANES and pl.cdiv(nc, t) % 2 == 1:
            t -= SUBLANES
        if t >= SUBLANES:
            tb = t
    return tb


def _dwconv_kernel(wb_ref, x_ref, rc_ref, o_ref, *, H, W):
    # wb_ref: SMEM (10,) f32 scalar-prefetch table: 9 taps (row-major) + bias
    # x_ref : VMEM (TB, H*W) input block (planes on sublanes, plane on lanes)
    # rc_ref: VMEM (2, H*W) int32: row 0 = y index, row 1 = x index per lane
    # o_ref : VMEM (TB, H*W) output block
    HW = H * W
    x = x_ref[...].astype(jnp.float32)                 # convert once per block
    row = jnp.broadcast_to(rc_ref[0:1, :], x.shape)    # hoisted, shared by taps
    col = jnp.broadcast_to(rc_ref[1:2, :], x.shape)
    row_ok = {-1: row >= 1, 0: None, 1: row <= H - 2}
    col_ok = {-1: col >= 1, 0: None, 1: col <= W - 2}

    acc = jnp.full(x.shape, wb_ref[KSIZE * KSIZE], jnp.float32)   # bias-init
    for kh in range(KSIZE):
        for kw in range(KSIZE):
            dy, dx = kh - PAD, kw - PAD
            tap = wb_ref[kh * KSIZE + kw]
            d = dy * W + dx                    # lane shift inside the plane
            if d == 0:
                shifted = x
            else:
                # shifted[:, i] = x[:, (i + d) % HW]; wrapped lanes masked below.
                shifted = pltpu.roll(x, (-d) % HW, 1)
            mask = row_ok[dy]
            if col_ok[dx] is not None:
                mask = col_ok[dx] if mask is None else jnp.logical_and(mask, col_ok[dx])
            if mask is not None:
                shifted = jnp.where(mask, shifted, 0.0)
            acc = acc + tap * shifted
    o_ref[...] = acc.astype(o_ref.dtype)


def depthwise_conv_forward(x, weight, bias):
    """x: (N, C, H, W); weight: (1, 1, 3, 3); bias: (1,)  ->  (N, C, H, W)."""
    N, C, H, W = x.shape
    nc, hw = N * C, H * W
    itemsize = jnp.dtype(x.dtype).itemsize

    cap = _vmem_capacity_bytes()
    tb = _pick_tb(nc, hw, itemsize, vmem_budget=int(0.4 * cap))
    grid = pl.cdiv(nc, tb)
    # TODO(synk): very large planes (H*W in the multi-million range) exceed VMEM
    # even at tb=8; that regime needs a second grid axis over rows with a 1-row
    # halo (not needed for the feature-map sizes this module sees).

    # Free, contiguous view -- no relayout / transpose passes around the kernel.
    x2 = x.reshape(nc, hw)

    # 9 taps + bias as a flat f32 SMEM-prefetched table.
    wb = jnp.concatenate(
        [weight.reshape(KSIZE * KSIZE), bias.reshape(1)]).astype(jnp.float32)
    # Per-lane (y, x) coordinates of the flattened plane (tiny, grid-invariant);
    # avoids in-kernel integer div/mod for the edge-validity masks.
    lane = jnp.arange(hw, dtype=jnp.int32)
    rc = jnp.stack([lane // W, lane % W])                       # (2, H*W) int32

    kernel = functools.partial(_dwconv_kernel, H=H, W=W)
    out2 = pl.pallas_call(
        kernel,
        out_shape=jax.ShapeDtypeStruct((nc, hw), x.dtype),
        grid_spec=pltpu.PrefetchScalarGridSpec(
            num_scalar_prefetch=1,
            grid=(grid,),
            in_specs=[
                pl.BlockSpec((tb, hw), lambda i, _wb: (i, 0)),   # plane tile
                pl.BlockSpec((2, hw), lambda i, _wb: (0, 0)),    # coords (invariant)
            ],
            out_specs=pl.BlockSpec((tb, hw), lambda i, _wb: (i, 0)),
        ),
        compiler_params=pltpu.CompilerParams(
            dimension_semantics=("parallel",),
            vmem_limit_bytes=int(0.75 * cap),
        ),
    )(wb, x2, rc)

    return out2.reshape(N, C, H, W)


def _reference(x, weight, bias):
    """Pure-JAX reference identical to the PyTorch forward."""
    N, C, H, W = x.shape
    x_flat = x.reshape(N * C, 1, H, W)
    out = jax.lax.conv_general_dilated(
        x_flat.astype(jnp.float32), weight.astype(jnp.float32),
        window_strides=(1, 1), padding=((PAD, PAD), (PAD, PAD)),
        dimension_numbers=("NCHW", "OIHW", "NCHW"))
    out = out + bias.reshape(1, 1, 1, 1)
    return out.reshape(N, C, H, W).astype(x.dtype)


if __name__ == "__main__":
    key = jax.random.PRNGKey(0)
    k_x, k_w, k_b = jax.random.split(key, 3)

    N, C, H, W = 2, 4, 16, 16
    x = jax.random.normal(k_x, (N, C, H, W), dtype=jnp.float32)

    # Deterministic parameter init (Conv2d(1,1,3,3) -> weight (1,1,3,3), bias (1,))
    fan_in = 1 * KSIZE * KSIZE
    bound = 1.0 / (fan_in ** 0.5)
    weight = jax.random.uniform(k_w, (1, 1, KSIZE, KSIZE), jnp.float32, -bound, bound)
    bias = jax.random.uniform(k_b, (1,), jnp.float32, -bound, bound)

    out = depthwise_conv_forward(x, weight, bias)
    out = jax.block_until_ready(out)

    ref = _reference(x, weight, bias)
    assert out.shape == (N, C, H, W)
    assert jnp.allclose(out, ref, atol=1e-5, rtol=1e-5), "mismatch vs reference conv"

    print("KERNEL_OK")
</pallas_src>

<mosaic_0001>
module attributes {stable_mosaic.version = 11 : i64} {
  func.func @_dwconv_kernel(%arg0: i32, %arg1: memref<10xf32, #tpu.memory_space<smem>>, %arg2: memref<8x256xf32, #tpu.memory_space<vmem>>, %arg3: memref<2x256xi32, #tpu.memory_space<vmem>>, %arg4: memref<8x256xf32, #tpu.memory_space<vmem>>) attributes {dimension_semantics = [#tpu.dimension_semantics<parallel>], iteration_bounds = array<i64: 1>, scalar_prefetch = 1 : i64, scratch_operands = 0 : i64, tpu.core_type = #tpu.core_type<tc>, window_params = [{transform_indices = @transform_0, window_bounds = array<i64: 8, 256>}, {pipeline_mode = #tpu.pipeline_mode<synchronous>, transform_indices = @transform_1, window_bounds = array<i64: 2, 256>}, {transform_indices = @transform_2, window_bounds = array<i64: 8, 256>}]} {
    %c0 = arith.constant 0 : index
    %c0_0 = arith.constant 0 : index
    %0 = vector.load %arg2[%c0, %c0_0] : memref<8x256xf32, #tpu.memory_space<vmem>>, vector<8x256xf32>
    %c0_1 = arith.constant 0 : index
    %c0_2 = arith.constant 0 : index
    %1 = vector.load %arg3[%c0_1, %c0_2] : memref<2x256xi32, #tpu.memory_space<vmem>>, vector<1x256xi32>
    %2 = vector.shape_cast %1 : vector<1x256xi32> to vector<1x256xi32>
    %3 = vector.broadcast %2 : vector<1x256xi32> to vector<8x256xi32>
    %c1 = arith.constant 1 : index
    %c0_3 = arith.constant 0 : index
    %4 = vector.load %arg3[%c1, %c0_3] : memref<2x256xi32, #tpu.memory_space<vmem>>, vector<1x256xi32>
    %5 = vector.shape_cast %4 : vector<1x256xi32> to vector<1x256xi32>
    %6 = vector.broadcast %5 : vector<1x256xi32> to vector<8x256xi32>
    %c1_i32 = arith.constant 1 : i32
    %7 = vector.broadcast %c1_i32 : i32 to vector<8x256xi32>
    %8 = arith.cmpi sge, %3, %7 : vector<8x256xi32>
    %c14_i32 = arith.constant 14 : i32
    %9 = vector.broadcast %c14_i32 : i32 to vector<8x256xi32>
    %10 = arith.cmpi sle, %3, %9 : vector<8x256xi32>
    %c1_i32_4 = arith.constant 1 : i32
    %11 = vector.broadcast %c1_i32_4 : i32 to vector<8x256xi32>
    %12 = arith.cmpi sge, %6, %11 : vector<8x256xi32>
    %c14_i32_5 = arith.constant 14 : i32
    %13 = vector.broadcast %c14_i32_5 : i32 to vector<8x256xi32>
    %14 = arith.cmpi sle, %6, %13 : vector<8x256xi32>
    %c9 = arith.constant 9 : index
    %15 = memref.load %arg1[%c9] : memref<10xf32, #tpu.memory_space<smem>>
    %16 = vector.broadcast %15 : f32 to vector<8x256xf32>
    %c0_6 = arith.constant 0 : index
    %17 = memref.load %arg1[%c0_6] : memref<10xf32, #tpu.memory_space<smem>>
    %c17_i32 = arith.constant 17 : i32
    %18 = tpu.dynamic_rotate %0 by %c17_i32 dim 1 : vector<8x256xf32>, i32 -> vector<8x256xf32>
    %19 = arith.andi %8, %12 : vector<8x256xi1>
    %cst = arith.constant 0.000000e+00 : f32
    %20 = vector.broadcast %cst : f32 to vector<8x256xf32>
    %21 = arith.select %19, %18, %20 : vector<8x256xi1>, vector<8x256xf32>
    %22 = vector.broadcast %17 : f32 to vector<8x256xf32>
    %23 = arith.mulf %22, %21 : vector<8x256xf32>
    %24 = arith.addf %16, %23 : vector<8x256xf32>
    %c1_7 = arith.constant 1 : index
    %25 = memref.load %arg1[%c1_7] : memref<10xf32, #tpu.memory_space<smem>>
    %c16_i32 = arith.constant 16 : i32
    %26 = tpu.dynamic_rotate %0 by %c16_i32 dim 1 : vector<8x256xf32>, i32 -> vector<8x256xf32>
    %cst_8 = arith.constant 0.000000e+00 : f32
    %27 = vector.broadcast %cst_8 : f32 to vector<8x256xf32>
    %28 = arith.select %8, %26, %27 : vector<8x256xi1>, vector<8x256xf32>
    %29 = vector.broadcast %25 : f32 to vector<8x256xf32>
    %30 = arith.mulf %29, %28 : vector<8x256xf32>
    %31 = arith.addf %24, %30 : vector<8x256xf32>
    %c2 = arith.constant 2 : index
    %32 = memref.load %arg1[%c2] : memref<10xf32, #tpu.memory_space<smem>>
    %c15_i32 = arith.constant 15 : i32
    %33 = tpu.dynamic_rotate %0 by %c15_i32 dim 1 : vector<8x256xf32>, i32 -> vector<8x256xf32>
    %34 = arith.andi %8, %14 : vector<8x256xi1>
    %cst_9 = arith.constant 0.000000e+00 : f32
    %35 = vector.broadcast %cst_9 : f32 to vector<8x256xf32>
    %36 = arith.select %34, %33, %35 : vector<8x256xi1>, vector<8x256xf32>
    %37 = vector.broadcast %32 : f32 to vector<8x256xf32>
    %38 = arith.mulf %37, %36 : vector<8x256xf32>
    %39 = arith.addf %31, %38 : vector<8x256xf32>
    %c3 = arith.constant 3 : index
    %40 = memref.load %arg1[%c3] : memref<10xf32, #tpu.memory_space<smem>>
    %c1_i32_10 = arith.constant 1 : i32
    %41 = tpu.dynamic_rotate %0 by %c1_i32_10 dim 1 : vector<8x256xf32>, i32 -> vector<8x256xf32>
    %cst_11 = arith.constant 0.000000e+00 : f32
    %42 = vector.broadcast %cst_11 : f32 to vector<8x256xf32>
    %43 = arith.select %12, %41, %42 : vector<8x256xi1>, vector<8x256xf32>
    %44 = vector.broadcast %40 : f32 to vector<8x256xf32>
    %45 = arith.mulf %44, %43 : vector<8x256xf32>
    %46 = arith.addf %39, %45 : vector<8x256xf32>
    %c4 = arith.constant 4 : index
    %47 = memref.load %arg1[%c4] : memref<10xf32, #tpu.memory_space<smem>>
    %48 = vector.broadcast %47 : f32 to vector<8x256xf32>
    %49 = arith.mulf %48, %0 : vector<8x256xf32>
    %50 = arith.addf %46, %49 : vector<8x256xf32>
    %c5 = arith.constant 5 : index
    %51 = memref.load %arg1[%c5] : memref<10xf32, #tpu.memory_space<smem>>
    %c255_i32 = arith.constant 255 : i32
    %52 = tpu.dynamic_rotate %0 by %c255_i32 dim 1 : vector<8x256xf32>, i32 -> vector<8x256xf32>
    %cst_12 = arith.constant 0.000000e+00 : f32
    %53 = vector.broadcast %cst_12 : f32 to vector<8x256xf32>
    %54 = arith.select %14, %52, %53 : vector<8x256xi1>, vector<8x256xf32>
    %55 = vector.broadcast %51 : f32 to vector<8x256xf32>
    %56 = arith.mulf %55, %54 : vector<8x256xf32>
    %57 = arith.addf %50, %56 : vector<8x256xf32>
    %c6 = arith.constant 6 : index
    %58 = memref.load %arg1[%c6] : memref<10xf32, #tpu.memory_space<smem>>
    %c241_i32 = arith.constant 241 : i32
    %59 = tpu.dynamic_rotate %0 by %c241_i32 dim 1 : vector<8x256xf32>, i32 -> vector<8x256xf32>
    %60 = arith.andi %10, %12 : vector<8x256xi1>
    %cst_13 = arith.constant 0.000000e+00 : f32
    %61 = vector.broadcast %cst_13 : f32 to vector<8x256xf32>
    %62 = arith.select %60, %59, %61 : vector<8x256xi1>, vector<8x256xf32>
    %63 = vector.broadcast %58 : f32 to vector<8x256xf32>
    %64 = arith.mulf %63, %62 : vector<8x256xf32>
    %65 = arith.addf %57, %64 : vector<8x256xf32>
    %c7 = arith.constant 7 : index
    %66 = memref.load %arg1[%c7] : memref<10xf32, #tpu.memory_space<smem>>
    %c240_i32 = arith.constant 240 : i32
    %67 = tpu.dynamic_rotate %0 by %c240_i32 dim 1 : vector<8x256xf32>, i32 -> vector<8x256xf32>
    %cst_14 = arith.constant 0.000000e+00 : f32
    %68 = vector.broadcast %cst_14 : f32 to vector<8x256xf32>
    %69 = arith.select %10, %67, %68 : vector<8x256xi1>, vector<8x256xf32>
    %70 = vector.broadcast %66 : f32 to vector<8x256xf32>
    %71 = arith.mulf %70, %69 : vector<8x256xf32>
    %72 = arith.addf %65, %71 : vector<8x256xf32>
    %c8 = arith.constant 8 : index
    %73 = memref.load %arg1[%c8] : memref<10xf32, #tpu.memory_space<smem>>
    %c239_i32 = arith.constant 239 : i32
    %74 = tpu.dynamic_rotate %0 by %c239_i32 dim 1 : vector<8x256xf32>, i32 -> vector<8x256xf32>
    %75 = arith.andi %10, %14 : vector<8x256xi1>
    %cst_15 = arith.constant 0.000000e+00 : f32
    %76 = vector.broadcast %cst_15 : f32 to vector<8x256xf32>
    %77 = arith.select %75, %74, %76 : vector<8x256xi1>, vector<8x256xf32>
    %78 = vector.broadcast %73 : f32 to vector<8x256xf32>
    %79 = arith.mulf %78, %77 : vector<8x256xf32>
    %80 = arith.addf %72, %79 : vector<8x256xf32>
    %c0_16 = arith.constant 0 : index
    %c0_17 = arith.constant 0 : index
    %81 = vector.load %arg4[%c0_16, %c0_17] : memref<8x256xf32, #tpu.memory_space<vmem>>, vector<8x256xf32>
    tpu.vector_store %arg4[%c0_16, %c0_17], %80 {strides = array<i32>} : memref<8x256xf32, #tpu.memory_space<vmem>>, vector<8x256xf32>,
    return
  }
  func.func @transform_0(%arg0: i32, %arg1: memref<10xf32, #tpu.memory_space<smem>>) -> (i32, i32) {
    %c0_i32 = arith.constant 0 : i32
    %c0_i32_0 = arith.constant 0 : i32
    return %arg0, %c0_i32 : i32, i32
  }
  func.func @transform_1(%arg0: i32, %arg1: memref<10xf32, #tpu.memory_space<smem>>) -> (i32, i32) {
    %c0_i32 = arith.constant 0 : i32
    %c0_i32_0 = arith.constant 0 : i32
    %c0_i32_1 = arith.constant 0 : i32
    return %c0_i32, %c0_i32_0 : i32, i32
  }
  func.func @transform_2(%arg0: i32, %arg1: memref<10xf32, #tpu.memory_space<smem>>) -> (i32, i32) {
    %c0_i32 = arith.constant 0 : i32
    %c0_i32_0 = arith.constant 0 : i32
    return %arg0, %c0_i32 : i32, i32
  }
}

</mosaic_0001>

<bundles_post_ra>
// kernel: tpu_custom_call.1
= control target key start
LH: loop header
LB: loop body
LE: loop exit
PB: predicated region body
PF: predicated region fallthrough
CT: control target
= control target key end

     0   :  { %s543_s0 = inlined_call_operand.hbm [shape: f32[10], index: 0, kind: input, shape index: {}]   ;;  %s544_s1 = inlined_call_operand.hbm [shape: f32[8,256], index: 1, kind: input, shape index: {}]   ;;  %s545_s2 = inlined_call_operand.vmem [shape: s32[2,256], index: 2, kind: input, shape index: {}]   ;;  %s546_s3 = inlined_call_operand.hbm [shape: f32[8,256], index: 3, kind: output, shape index: {}]  }
   0x1   :  { %s234_s14 = scalar_lea.hbm %s543_s0, 16 }
   0x2   :  { %p235_p0 = scmp.ne.s32.totalorder %s543_s0, %s234_s14  ;;  %p238_p1 = scmp.lt.u32.totalorder %s234_s14, %s543_s0 }
   0x4   :  { %p240_p2 = pnand %p238_p1, %p235_p0 }
   0x6   :  { %243 = shalt.err (!%p240_p2)  }
   0x7   :  { %s294_s19 = smov [#allocation3]  }
   0x8   :  { %9 = dma.hbm_to_smem %s543_s0, 16, %s294_s19, [#allocation2] }
   0x9   :  { %288 = dma.done.wait [#allocation2], 16 }
   0xa   :  { %289 = vsyncadd [#allocation2], 4294967280 }
   0xb   :  { %11 = sfence }
   0xc   :  { %12 = vsyncpa [#allocation5], 0 }
   0xd   :  { %13 = vsyncpa [#allocation6], 0  ;;  %s295_s22 = smov [#allocation4]   ;;  %s244_s26 = scalar_lea.hbm %s544_s1, 256 }
   0xe   :  { %s20_s23 = sshll.u32 %s295_s22, 4  ;;  %p245_p3 = scmp.ne.s32.totalorder %s544_s1, %s244_s26  ;;  %s21_s23 = int_to_ptr.vmem [resolvable:$true] %s20_s23 }
   0xf   :  { %p248_p4 = scmp.lt.u32.totalorder %s244_s26, %s544_s1 }
  0x11   :  { %p250_p5 = pnand %p248_p4, %p245_p3 }
  0x13   :  { %253 = shalt.err (!%p250_p5)
}
  0x14   :  { %s254_s0 = scalar_lea.vmem %s21_s23, 256  ;;  %p259_p7 = scmp.lt.s32.totalorder %s21_s23, %s21_s23 }
  0x15   :  { %p255_p6 = scmp.ne.s32.totalorder %s21_s23, %s254_s0  ;;  %p260_p8 = scmp.lt.s32.totalorder %s254_s0, %s254_s0 }
  0x17   :  { %p261_p9 = por %p260_p8, %p259_p7 }
  0x19   :  { %p262_p10 = pnand %p261_p9, %p255_p6 }
  0x1b   :  { %265 = shalt.err (!%p262_p10)
}
  0x1c   :  { %23 = dma.hbm_to_vmem [thread:$0]  %s544_s1, 256, %s21_s23, [#allocation5]  }
  0x1d   :  { %290 = dma.done.wait [#allocation5], 256  }
  0x1e   :  { %291 = vsyncadd [#allocation5], 4294967040  ;;  %v349_v0 = vld [vmem:[#allocation4] sm:$0xff]  ;;  %s296_s6 = smov 16   ;;  %s297_s7 = smov 17   ;;  %v353_v1 = vld [vmem:[#allocation4 + $0x8] sm:$0xff]  ;;  %v32_v2 = vlaneseq }
  0x1f   :  { %80 = vrot.lane.b32.xlu1 %v349_v0, %s296_s6  ;;  %61 = vrot.lane.b32.xlu0 %v349_v0, %s297_s7  ;;  %s298_s8 = smov 15   ;;  %s299_s1 = smov 1   ;;  %v31_v6 = vld [vmem:[%s545_s2] ss:$2 sm:$0x3] }
  0x20   :  { %s300_s9 = smov 127   ;;  %s301_s10 = smov 113   ;;  %v33_v3 = vshrl.u32 %v32_v2, 7  ;;  %v213_v7 = vld [vmem:[%s545_s2 + $0x1] ss:$2 sm:$0x3] }
  0x21   :  { %s302_s11 = smov 112   ;;  %s303_s12 = smov 111   ;;  %v385_v12 = vand.u32 127, %v32_v2 }
  0x22   :  { %v34_v4 = vsub.s32 0, %v33_v3  ;;  %v38_v5 = vsub.s32 1, %v33_v3  ;;  %s383_s17 = sld [smem:[#allocation3]]  ;;  %s387_s18 = sld [smem:[#allocation3 + $0x1]] }
  0x23   :  { %82 = vrot.lane.b32.xlu1 %v353_v1, %s296_s6  ;;  %63 = vrot.lane.b32.xlu0 %v353_v1, %s297_s7  ;;  %s389_s19 = sld [smem:[#allocation3 + $0x9]]  ;;  %s395_s2 = sld [smem:[#allocation3 + $0x2]]  ;;  %vm84_vm4 = vcmp.lt.s32.totalorder %v385_v12, 16  ;;  %vm67_vm5 = vcmp.lt.s32.totalorder %v385_v12, 17  ;;  %vm99_vm10 = vcmp.lt.s32.totalorder %v385_v12, 15  ;;  %vm116_vm13 = vcmp.lt.s32.totalorder %v385_v12, 1 }
  0x24   :  { %v375_v8 = vrot.slane %v31_v6, %v34_v4  ;;  %v377_v9 = vrot.slane %v213_v7, %v34_v4  ;;  %v379_v10 = vrot.slane %v31_v6, %v38_v5  ;;  %v381_v11 = vrot.slane %v213_v7, %v38_v5  ;;  %s419_s20 = sld [smem:[#allocation3 + $0x3]]  ;;  %s449_s21 = sld [smem:[#allocation3 + $0x4]] }
  0x25   :  { %s460_s22 = sld [smem:[#allocation3 + $0x5]]  ;;  %vm137_vm14 = vcmp.lt.s32.totalorder %v385_v12, 127  ;;  %s471_s23 = sld [smem:[#allocation3 + $0x6]] }
  0x26   :  { %vm50_vm0 = vcmp.ge.s32.totalorder %v375_v8, 1  ;;  %vm54_vm1 = vcmp.ge.s32.totalorder %v377_v9, 1  ;;  %vm51_vm2 = vcmp.ge.s32.totalorder %v379_v10, 1  ;;  %vm55_vm3 = vcmp.ge.s32.totalorder %v381_v11, 1  ;;  %s476_s24 = sld [smem:[#allocation3 + $0x7]]  ;;  %s502_s25 = sld [smem:[#allocation3 + $0x8]] }
  0x27   :  { %97 = vrot.lane.b32.xlu1 %v353_v1, %s298_s8  ;;  %95 = vrot.lane.b32.xlu0 %v349_v0, %s298_s8  ;;  %vm403_vm6 = vmand %vm50_vm0, %vm54_vm1  ;;  %vm56_vm8 = vcmp.le.s32.totalorder %v377_v9, 14  ;;  %vm57_vm9 = vcmp.le.s32.totalorder %v381_v11, 14  ;;  %vm52_vm15 = vcmp.le.s32.totalorder %v375_v8, 14  ;;  %s304_s26 = smov [#allocation7]  }
  0x28   :  { %vm411_vm7 = vmand %vm51_vm2, %vm55_vm3  ;;  %v74_v18 = vstv %s383_s17  ;;  %v89_v24 = vstv %s387_s18  ;;  %s204_s27 = sshll.u32 %s304_s26, 4  ;;  %s205_s27 = int_to_ptr.vmem [resolvable:$true] %s204_s27 }
  0x29   :  { %v59_v25 = vstv %s389_s19  ;;  %vm431_vm11 = vmand %vm50_vm0, %vm56_vm8  ;;  %v106_v35 = vstv %s395_s2  ;;  %s266_s28 = scalar_lea.vmem %s205_s27, 256  ;;  %p271_p12 = scmp.lt.s32.totalorder %s205_s27, %s205_s27 }
  0x2a   :  { %vm443_vm12 = vmand %vm51_vm2, %vm57_vm9  ;;  %v121_v48 = vstv %s419_s20  ;;  %v127_v59 = vstv %s449_s21  ;;  %p267_p11 = scmp.ne.s32.totalorder %s205_s27, %s266_s28  ;;  %p272_p13 = scmp.lt.s32.totalorder %s266_s28, %s266_s28 }
  0x2b   :  { %114 = vrot.lane.b32.xlu1 %v353_v1, %s299_s1  ;;  %112 = vrot.lane.b32.xlu0 %v349_v0, %s299_s1  ;;  %v129_v6 = vmul.f32 %v127_v59, %v353_v1  ;;  %v128_v7 = vmul.f32 %v127_v59, %v349_v0 }
  0x2c   :  { %p273_p0 = por %p272_p13, %p271_p12 }
  0x2e   :  { %p274_p1 = pnand %p273_p0, %p267_p11 }
  0x2f   :  { %135 = vrot.lane.b32.xlu1 %v353_v1, %s300_s9  ;;  %133 = vrot.lane.b32.xlu0 %v349_v0, %s300_s9 }
  0x33   :  { %150 = vrot.lane.b32.xlu1 %v353_v1, %s301_s10  ;;  %148 = vrot.lane.b32.xlu0 %v349_v0, %s301_s10 }
  0x37   :  { %167 = vrot.lane.b32.xlu1 %v353_v1, %s302_s11  ;;  %165 = vrot.lane.b32.xlu0 %v349_v0, %s302_s11 }
  0x3b   :  { %182 = vrot.lane.b32.xlu1 %v353_v1, %s303_s12  ;;  %180 = vrot.lane.b32.xlu0 %v349_v0, %s303_s12 }
  0x91   :  { %v81_v13 = vpop.permute.xlu1 %80  ;;  %v62_v14 = vpop.permute.xlu0 %61 }
  0x95   :  { %v83_v17 = vpop.permute.xlu1 %82  ;;  %v64_v19 = vpop.permute.xlu0 %63 }
  0x96   :  { %v85_v20 = vsel %vm84_vm4, %v81_v13, %v83_v17  ;;  %v86_v21 = vsel %vm84_vm4, %v83_v17, %v81_v13  ;;  %v68_v22 = vsel %vm67_vm5, %v62_v14, %v64_v19  ;;  %v69_v23 = vsel %vm67_vm5, %v64_v19, %v62_v14  ;;  %vm483_vm4 = vmand %vm52_vm15, %vm54_vm1 }
  0x97   :  { %v72_v26 = vsel %vm403_vm6, %v69_v23, 0.0  ;;  %v73_v27 = vsel %vm411_vm7, %v68_v22, 0.0  ;;  %v87_v29 = vsel %vm50_vm0, %v86_v21, 0.0  ;;  %v88_v30 = vsel %vm51_vm2, %v85_v20, 0.0  ;;  %vm520_vm6 = vmand %vm52_vm15, %vm56_vm8 }
  0x98   :  { %v75_v31 = vmul.f32 %v74_v18, %v72_v26  ;;  %v76_v32 = vmul.f32 %v74_v18, %v73_v27  ;;  %v90_v41 = vmul.f32 %v89_v24, %v87_v29  ;;  %v91_v42 = vmul.f32 %v89_v24, %v88_v30 }
  0x99   :  { %v98_v34 = vpop.permute.xlu1 %97  ;;  %v96_v36 = vpop.permute.xlu0 %95  ;;  %vm53_vm0 = vcmp.le.s32.totalorder %v379_v10, 14  ;;  %vm152_vm2 = vcmp.lt.s32.totalorder %v385_v12, 113  ;;  %v142_v14 = vstv %s460_s22  ;;  %v159_v19 = vstv %s471_s23 }
  0x9a   :  { %v77_v37 = vadd.f32 %v75_v31, %v59_v25  ;;  %v78_v38 = vadd.f32 %v76_v32, %v59_v25  ;;  %v100_v39 = vsel %vm99_vm10, %v96_v36, %v98_v34  ;;  %v101_v40 = vsel %vm99_vm10, %v98_v34, %v96_v36  ;;  %vm493_vm5 = vmand %vm53_vm0, %vm55_vm3 }
  0x9b   :  { %v104_v43 = vsel %vm431_vm11, %v101_v40, 0.0  ;;  %v105_v44 = vsel %vm443_vm12, %v100_v39, 0.0  ;;  %v174_v27 = vstv %s476_s24  ;;  %vm188_vm7 = vmand %vm53_vm0, %vm57_vm9 }
  0x9c   :  { %v92_v45 = vadd.f32 %v90_v41, %v77_v37  ;;  %v93_v46 = vadd.f32 %v91_v42, %v78_v38  ;;  %v107_v50 = vmul.f32 %v106_v35, %v104_v43  ;;  %v108_v51 = vmul.f32 %v106_v35, %v105_v44 }
  0x9d   :  { %v115_v47 = vpop.permute.xlu1 %114  ;;  %v113_v49 = vpop.permute.xlu0 %112  ;;  %v191_v41 = vstv %s502_s25 }
  0x9e   :  { %v117_v52 = vsel %vm116_vm13, %v113_v49, %v115_v47  ;;  %v118_v53 = vsel %vm116_vm13, %v115_v47, %v113_v49  ;;  %v109_v61 = vadd.f32 %v107_v50, %v92_v45  ;;  %v110_v62 = vadd.f32 %v108_v51, %v93_v46 }
  0x9f   :  { %v119_v54 = vsel %vm54_vm1, %v118_v53, 0.0  ;;  %v120_v55 = vsel %vm55_vm3, %v117_v52, 0.0  ;;  %vm169_vm1 = vcmp.lt.s32.totalorder %v385_v12, 112  ;;  %vm184_vm3 = vcmp.lt.s32.totalorder %v385_v12, 111 }
  0xa0   :  { %v122_v56 = vmul.f32 %v121_v48, %v119_v54  ;;  %v123_v57 = vmul.f32 %v121_v48, %v120_v55 }
  0xa1   :  { %v136_v58 = vpop.permute.xlu1 %135  ;;  %v134_v60 = vpop.permute.xlu0 %133 }
  0xa2   :  { %v138_v63 = vsel %vm137_vm14, %v134_v60, %v136_v58  ;;  %v139_v2 = vsel %vm137_vm14, %v136_v58, %v134_v60  ;;  %v124_v4 = vadd.f32 %v122_v56, %v109_v61  ;;  %v125_v5 = vadd.f32 %v123_v57, %v110_v62 }
  0xa3   :  { %v140_v15 = vsel %vm56_vm8, %v138_v63, 0.0  ;;  %v141_v16 = vsel %vm57_vm9, %v139_v2, 0.0 }
  0xa4   :  { %v131_v22 = vadd.f32 %v129_v6, %v125_v5  ;;  %v130_v23 = vadd.f32 %v128_v7, %v124_v4  ;;  %v143_v24 = vmul.f32 %v142_v14, %v140_v15  ;;  %v144_v25 = vmul.f32 %v142_v14, %v141_v16 }
  0xa5   :  { %v151_v17 = vpop.permute.xlu1 %150  ;;  %v149_v1 = vpop.permute.xlu0 %148 }
  0xa6   :  { %v153_v0 = vsel %vm152_vm2, %v149_v1, %v151_v17  ;;  %v154_v18 = vsel %vm152_vm2, %v151_v17, %v149_v1  ;;  %v145_v36 = vadd.f32 %v143_v24, %v130_v23  ;;  %v146_v37 = vadd.f32 %v144_v25, %v131_v22 }
  0xa7   :  { %v157_v20 = vsel %vm483_vm4, %v153_v0, 0.0  ;;  %v158_v21 = vsel %vm493_vm5, %v154_v18, 0.0 }
  0xa8   :  { %v160_v29 = vmul.f32 %v159_v19, %v157_v20  ;;  %v161_v30 = vmul.f32 %v159_v19, %v158_v21 }
  0xa9   :  { %v168_v26 = vpop.permute.xlu1 %167  ;;  %v166_v28 = vpop.permute.xlu0 %165 }
  0xaa   :  { %v170_v31 = vsel %vm169_vm1, %v166_v28, %v168_v26  ;;  %v171_v32 = vsel %vm169_vm1, %v168_v26, %v166_v28  ;;  %v162_v42 = vadd.f32 %v160_v29, %v145_v36  ;;  %v163_v9 = vadd.f32 %v161_v30, %v146_v37 }
  0xab   :  { %v172_v33 = vsel %vm52_vm15, %v170_v31, 0.0  ;;  %v173_v34 = vsel %vm53_vm0, %v171_v32, 0.0 }
  0xac   :  { %v175_v38 = vmul.f32 %v174_v27, %v172_v33  ;;  %v176_v39 = vmul.f32 %v174_v27, %v173_v34 }
  0xad   :  { %v183_v40 = vpop.permute.xlu1 %182  ;;  %v181_v12 = vpop.permute.xlu0 %180 }
  0xae   :  { %v185_v43 = vsel %vm184_vm3, %v181_v12, %v183_v40  ;;  %v186_v8 = vsel %vm184_vm3, %v183_v40, %v181_v12  ;;  %v177_v46 = vadd.f32 %v175_v38, %v162_v42  ;;  %v178_v47 = vadd.f32 %v176_v39, %v163_v9 }
  0xaf   :  { %v189_v44 = vsel %vm520_vm6, %v185_v43, 0.0  ;;  %v190_v45 = vsel %vm188_vm7, %v186_v8, 0.0 }
  0xb0   :  { %v192_v48 = vmul.f32 %v191_v41, %v189_v44  ;;  %v193_v11 = vmul.f32 %v191_v41, %v190_v45 }
  0xb2   :  { %v194_v49 = vadd.f32 %v192_v48, %v177_v46  ;;  %v195_v10 = vadd.f32 %v193_v11, %v178_v47 }
  0xb4   :  { %196 = vst [vmem:[#allocation7] sm:$0xff] %v194_v49  ;;  %197 = vst [vmem:[#allocation7 + $0x8] sm:$0xff] %v195_v10 }
  0xb5   :  { %277 = shalt.err (!%p274_p1)
}
  0xb6   :  { %s278_s0 = scalar_lea.hbm %s546_s3, 256 }
  0xb7   :  { %p279_p2 = scmp.ne.s32.totalorder %s546_s3, %s278_s0  ;;  %p282_p3 = scmp.lt.u32.totalorder %s278_s0, %s546_s3 }
  0xb9   :  { %p284_p4 = pnand %p282_p3, %p279_p2 }
  0xbb   :  { %287 = shalt.err (!%p284_p4)
}
  0xbc   :  { %207 = dma.vmem_to_hbm [thread:$0]  %s205_s27, 256, %s546_s3, [#allocation6]  }
  0xbd   :  { %292 = dma.done.wait [#allocation6], 256  }
  0xbe   :  { %293 = vsyncadd [#allocation6], 4294967040 }
  0xbf   :  { %211 = vsyncpa [#allocation5], 1 }
  0xc0   :  { %212 = vsyncpa [#allocation6], 1 }

</bundles_post_ra>
